<compile_context>
chip_gen: v7x
topology: tpu7x:2x2x1
jax: 0.10.0
libtpu: 0.0.40
codegen_flags: <defaults>
</compile_context>

<pallas_src>
import functools

import jax
import jax.numpy as jnp
from jax.experimental import pallas as pl
from jax.experimental.pallas import tpu as pltpu


def _round_up(x, m):
    return (x + m - 1) // m * m


def _invpref_kernel(u_inv_ref, i_inv_ref, u_env_ref, i_env_ref, env_ref,
                    w_ref, b_ref,
                    inv_score_ref, env_score_ref, env_out_ref):
    """One batch tile. All tensors are factor-major: (F, TB) / (1, TB) / (E, TB)."""
    f32 = jnp.float32

    u_inv = u_inv_ref[...].astype(f32)          # (F, TB)
    i_inv = i_inv_ref[...].astype(f32)
    u_env = u_env_ref[...].astype(f32)
    i_env = i_env_ref[...].astype(f32)
    env_e = env_ref[...].astype(f32)

    # Elementwise products (VPU), lane-dense.
    inv_pref = u_inv * i_inv                    # (F, TB)
    env_pref = u_env * i_env * env_e            # (F, TB)

    # Sublane reduction over the factor dim + sigmoid -> (1, TB) lane-dense rows.
    inv_sum = jnp.sum(inv_pref, axis=0, keepdims=True)      # (1, TB)
    env_sum = jnp.sum(env_pref, axis=0, keepdims=True)      # (1, TB)
    inv_score = jax.nn.sigmoid(inv_sum)
    env_mid_score = jax.nn.sigmoid(env_sum)

    inv_score_ref[...] = inv_score
    env_score_ref[...] = inv_score * env_mid_score

    # Env classifier on the VPU (E is tiny; do NOT feed a 2-column matmul to
    # the MXU). logits[e, :] = sum_f W[f, e] * inv_pref[f, :] + b[e].
    w = w_ref[...].astype(f32)                  # (F, E), resident across tiles
    b = b_ref[...].astype(f32)                  # (E, 1), resident across tiles
    E = env_out_ref.shape[0]

    logit_rows = []
    for e in range(E):                          # static unroll (E small)
        w_col = w[:, e:e + 1]                                       # (F, 1)
        row = jnp.sum(inv_pref * w_col, axis=0, keepdims=True)      # (1, TB)
        logit_rows.append(row + b[e:e + 1, :])                      # (1, TB)

    # Numerically-stable log-softmax across the E rows, all (1, TB) elementwise.
    m = logit_rows[0]
    for e in range(1, E):
        m = jnp.maximum(m, logit_rows[e])
    shifted = [r - m for r in logit_rows]
    sum_exp = jnp.exp(shifted[0])
    for e in range(1, E):
        sum_exp = sum_exp + jnp.exp(shifted[e])
    lse = jnp.log(sum_exp)
    for e in range(E):
        env_out_ref[e:e + 1, :] = shifted[e] - lse


def invpref_forward(params, users_id, items_id, envs_id, alpha=0.0, *,
                    block_b=8192, compute_dtype=jnp.float32,
                    vmem_limit_bytes=None):
    """Forward pass of InvPrefImplicit.

    Returns (invariant_score (B,), env_aware_score (B,), env_outputs (B, E)).
    `alpha` only affects the backward pass (gradient reversal) -> ignored here.

    block_b: batch-tile size (rows per grid step; rounded to a multiple of 128).
             Default 8192 (f32) stays within the default scoped-VMEM limit on
             v5e/v6e/v7x; raise it (and vmem_limit_bytes) on v6e for max BW.
    compute_dtype: dtype of the gathered embedding tiles fed to the kernel
             (bf16 halves input HBM traffic; accumulation stays f32).
    """
    del alpha  # identity in forward (ReverseLayerF)

    B = users_id.shape[0]
    F = params["embed_user_invariant"].shape[1]
    E = params["classifier_weight"].shape[1]

    # --- tile / padding choices ---------------------------------------------
    tb = min(int(block_b), _round_up(B, 128))
    tb = max(128, _round_up(tb, 128))           # lane-dense tiles
    b_pad = _round_up(B, tb)
    n_tiles = b_pad // tb

    # --- glue: embedding gathers (plain JAX), transposed to factor-major ----
    def gather_t(table, ids):
        x = jnp.take(table, ids, axis=0).astype(compute_dtype).T    # (F, B)
        if b_pad != B:
            x = jnp.pad(x, ((0, 0), (0, b_pad - B)))                # zero pad
        return x

    u_inv = gather_t(params["embed_user_invariant"], users_id)      # (F, Bp)
    i_inv = gather_t(params["embed_item_invariant"], items_id)
    u_env = gather_t(params["embed_user_env_aware"], users_id)
    i_env = gather_t(params["embed_item_env_aware"], items_id)
    env_e = gather_t(params["embed_env"], envs_id)

    W = params["classifier_weight"].astype(jnp.float32)             # (F, E)
    b = params["classifier_bias"].astype(jnp.float32).reshape(E, 1)  # (E, 1)

    # --- BlockSpecs ----------------------------------------------------------
    emb_spec = pl.BlockSpec((F, tb), lambda i: (0, i))
    w_spec = pl.BlockSpec((F, E), lambda i: (0, 0))    # resident across tiles
    b_spec = pl.BlockSpec((E, 1), lambda i: (0, 0))    # resident across tiles
    score_spec = pl.BlockSpec((1, tb), lambda i: (0, i))
    env_out_spec = pl.BlockSpec((E, tb), lambda i: (0, i))

    compiler_params = pltpu.CompilerParams(
        dimension_semantics=("parallel",),     # megacore sharding on v7x
        vmem_limit_bytes=vmem_limit_bytes,
    )

    inv_score, env_score, env_out = pl.pallas_call(
        _invpref_kernel,
        out_shape=(
            jax.ShapeDtypeStruct((1, b_pad), jnp.float32),
            jax.ShapeDtypeStruct((1, b_pad), jnp.float32),
            jax.ShapeDtypeStruct((E, b_pad), jnp.float32),
        ),
        grid=(n_tiles,),
        in_specs=[emb_spec, emb_spec, emb_spec, emb_spec, emb_spec,
                  w_spec, b_spec],
        out_specs=(score_spec, score_spec, env_out_spec),
        compiler_params=compiler_params,
    )(u_inv, i_inv, u_env, i_env, env_e, W, b)

    # Drop padded rows; return in the module's original layout.
    inv_score = inv_score[0, :B]
    env_score = env_score[0, :B]
    env_out = env_out[:, :B].T                                       # (B, E)
    return inv_score, env_score, env_out


def init_params(key, user_num, item_num, env_num, factor_num):
    """Deterministic parameter init matching the PyTorch module's _init_weight."""
    ks = jax.random.split(key, 7)
    std = 0.01
    params = {
        "embed_user_invariant": std * jax.random.normal(ks[0], (user_num, factor_num), jnp.float32),
        "embed_item_invariant": std * jax.random.normal(ks[1], (item_num, factor_num), jnp.float32),
        "embed_user_env_aware": std * jax.random.normal(ks[2], (user_num, factor_num), jnp.float32),
        "embed_item_env_aware": std * jax.random.normal(ks[3], (item_num, factor_num), jnp.float32),
        "embed_env":            std * jax.random.normal(ks[4], (env_num, factor_num), jnp.float32),
    }
    # Xavier uniform for Linear(factor_num -> env_num); stored as (F, E) = torch weight.T
    bound_w = (6.0 / (factor_num + env_num)) ** 0.5
    params["classifier_weight"] = jax.random.uniform(
        ks[5], (factor_num, env_num), jnp.float32, -bound_w, bound_w)
    # torch.nn.Linear default bias init: U(-1/sqrt(fan_in), 1/sqrt(fan_in))
    bound_b = 1.0 / (factor_num ** 0.5)
    params["classifier_bias"] = jax.random.uniform(
        ks[6], (env_num,), jnp.float32, -bound_b, bound_b)
    return params


def _reference_forward(params, users_id, items_id, envs_id):
    """Pure-JAX reference for sanity checks."""
    u_inv = params["embed_user_invariant"][users_id]
    i_inv = params["embed_item_invariant"][items_id]
    u_env = params["embed_user_env_aware"][users_id]
    i_env = params["embed_item_env_aware"][items_id]
    env_e = params["embed_env"][envs_id]
    inv_pref = u_inv * i_inv
    env_pref = u_env * i_env * env_e
    inv_score = jax.nn.sigmoid(jnp.sum(inv_pref, axis=1))
    env_score = inv_score * jax.nn.sigmoid(jnp.sum(env_pref, axis=1))
    logits = inv_pref @ params["classifier_weight"] + params["classifier_bias"]
    env_out = jax.nn.log_softmax(logits, axis=1)
    return inv_score, env_score, env_out


if __name__ == "__main__":
    user_num, item_num, env_num, factor_num = 13, 17, 2, 32
    batch = 8

    key = jax.random.PRNGKey(0)
    k_params, k_u, k_i, k_e = jax.random.split(key, 4)

    params = init_params(k_params, user_num, item_num, env_num, factor_num)
    users_id = jax.random.randint(k_u, (batch,), 0, user_num, dtype=jnp.int32)
    items_id = jax.random.randint(k_i, (batch,), 0, item_num, dtype=jnp.int32)
    envs_id = jax.random.randint(k_e, (batch,), 0, env_num, dtype=jnp.int32)

    # --- small batch, single tile, f32 ---
    inv_score, env_score, env_out = invpref_forward(
        params, users_id, items_id, envs_id, alpha=0.5)
    jax.block_until_ready((inv_score, env_score, env_out))

    ref_inv, ref_env, ref_out = _reference_forward(params, users_id, items_id, envs_id)
    assert inv_score.shape == (batch,)
    assert env_score.shape == (batch,)
    assert env_out.shape == (batch, env_num)
    assert jnp.allclose(inv_score, ref_inv, atol=1e-5)
    assert jnp.allclose(env_score, ref_env, atol=1e-5)
    assert jnp.allclose(env_out, ref_out, atol=1e-5)

    # --- multi-tile grid + padding path (f32) ---
    batch2 = 600
    k_u2, k_i2, k_e2 = jax.random.split(jax.random.PRNGKey(1), 3)
    users2 = jax.random.randint(k_u2, (batch2,), 0, user_num, dtype=jnp.int32)
    items2 = jax.random.randint(k_i2, (batch2,), 0, item_num, dtype=jnp.int32)
    envs2 = jax.random.randint(k_e2, (batch2,), 0, env_num, dtype=jnp.int32)

    inv2, env2, out2 = invpref_forward(params, users2, items2, envs2, block_b=128)
    jax.block_until_ready((inv2, env2, out2))
    r_inv2, r_env2, r_out2 = _reference_forward(params, users2, items2, envs2)
    assert inv2.shape == (batch2,) and out2.shape == (batch2, env_num)
    assert jnp.allclose(inv2, r_inv2, atol=1e-5)
    assert jnp.allclose(env2, r_env2, atol=1e-5)
    assert jnp.allclose(out2, r_out2, atol=1e-5)

    # --- bf16-input path (halved input HBM traffic), loose tolerance vs f32 ref ---
    inv3, env3, out3 = invpref_forward(
        params, users2, items2, envs2, block_b=256, compute_dtype=jnp.bfloat16)
    jax.block_until_ready((inv3, env3, out3))
    assert jnp.allclose(inv3, r_inv2, atol=1e-3, rtol=1e-2)
    assert jnp.allclose(env3, r_env2, atol=1e-3, rtol=1e-2)
    assert jnp.allclose(out3, r_out2, atol=1e-3, rtol=1e-2)

    print("KERNEL_OK")
</pallas_src>

<mosaic_0001>
module attributes {stable_mosaic.version = 11 : i64} {
  func.func @_invpref_kernel(%arg0: i32, %arg1: memref<32x128xf32, #tpu.memory_space<vmem>>, %arg2: memref<32x128xf32, #tpu.memory_space<vmem>>, %arg3: memref<32x128xf32, #tpu.memory_space<vmem>>, %arg4: memref<32x128xf32, #tpu.memory_space<vmem>>, %arg5: memref<32x128xf32, #tpu.memory_space<vmem>>, %arg6: memref<32x2xf32, #tpu.memory_space<vmem>>, %arg7: memref<2x1xf32, #tpu.memory_space<vmem>>, %arg8: memref<1x128xf32, #tpu.memory_space<vmem>>, %arg9: memref<1x128xf32, #tpu.memory_space<vmem>>, %arg10: memref<2x128xf32, #tpu.memory_space<vmem>>) attributes {dimension_semantics = [#tpu.dimension_semantics<parallel>], iteration_bounds = array<i64: 1>, scalar_prefetch = 0 : i64, scratch_operands = 0 : i64, tpu.core_type = #tpu.core_type<tc>, window_params = [{transform_indices = @transform_0, window_bounds = array<i64: 32, 128>}, {transform_indices = @transform_1, window_bounds = array<i64: 32, 128>}, {transform_indices = @transform_2, window_bounds = array<i64: 32, 128>}, {transform_indices = @transform_3, window_bounds = array<i64: 32, 128>}, {transform_indices = @transform_4, window_bounds = array<i64: 32, 128>}, {pipeline_mode = #tpu.pipeline_mode<synchronous>, transform_indices = @transform_5, window_bounds = array<i64: 32, 2>}, {pipeline_mode = #tpu.pipeline_mode<synchronous>, transform_indices = @transform_6, window_bounds = array<i64: 2, 1>}, {transform_indices = @transform_7, window_bounds = array<i64: 1, 128>}, {transform_indices = @transform_8, window_bounds = array<i64: 1, 128>}, {transform_indices = @transform_9, window_bounds = array<i64: 2, 128>}]} {
    %c0 = arith.constant 0 : index
    %c0_0 = arith.constant 0 : index
    %0 = vector.load %arg1[%c0, %c0_0] : memref<32x128xf32, #tpu.memory_space<vmem>>, vector<32x128xf32>
    %c0_1 = arith.constant 0 : index
    %c0_2 = arith.constant 0 : index
    %1 = vector.load %arg2[%c0_1, %c0_2] : memref<32x128xf32, #tpu.memory_space<vmem>>, vector<32x128xf32>
    %c0_3 = arith.constant 0 : index
    %c0_4 = arith.constant 0 : index
    %2 = vector.load %arg3[%c0_3, %c0_4] : memref<32x128xf32, #tpu.memory_space<vmem>>, vector<32x128xf32>
    %c0_5 = arith.constant 0 : index
    %c0_6 = arith.constant 0 : index
    %3 = vector.load %arg4[%c0_5, %c0_6] : memref<32x128xf32, #tpu.memory_space<vmem>>, vector<32x128xf32>
    %c0_7 = arith.constant 0 : index
    %c0_8 = arith.constant 0 : index
    %4 = vector.load %arg5[%c0_7, %c0_8] : memref<32x128xf32, #tpu.memory_space<vmem>>, vector<32x128xf32>
    %5 = arith.mulf %0, %1 : vector<32x128xf32>
    %6 = arith.mulf %2, %3 : vector<32x128xf32>
    %7 = arith.mulf %6, %4 : vector<32x128xf32>
    %cst = arith.constant dense<0.000000e+00> : vector<128xf32>
    %8 = vector.multi_reduction <add>, %5, %cst [0] : vector<32x128xf32> to vector<128xf32>
    %9 = vector.shape_cast %8 : vector<128xf32> to vector<1x128xf32>
    %cst_9 = arith.constant dense<0.000000e+00> : vector<128xf32>
    %10 = vector.multi_reduction <add>, %7, %cst_9 [0] : vector<32x128xf32> to vector<128xf32>
    %11 = vector.shape_cast %10 : vector<128xf32> to vector<1x128xf32>
    %12 = arith.negf %9 : vector<1x128xf32>
    %13 = math.exp %12 : vector<1x128xf32>
    %cst_10 = arith.constant 1.000000e+00 : f32
    %14 = vector.broadcast %cst_10 : f32 to vector<1x128xf32>
    %15 = arith.addf %14, %13 : vector<1x128xf32>
    %16 = arith.divf %14, %15 : vector<1x128xf32>
    %17 = arith.negf %11 : vector<1x128xf32>
    %18 = math.exp %17 : vector<1x128xf32>
    %cst_11 = arith.constant 1.000000e+00 : f32
    %19 = vector.broadcast %cst_11 : f32 to vector<1x128xf32>
    %20 = arith.addf %19, %18 : vector<1x128xf32>
    %21 = arith.divf %19, %20 : vector<1x128xf32>
    %c0_12 = arith.constant 0 : index
    %c0_13 = arith.constant 0 : index
    %22 = vector.load %arg8[%c0_12, %c0_13] : memref<1x128xf32, #tpu.memory_space<vmem>>, vector<1x128xf32>
    tpu.vector_store %arg8[%c0_12, %c0_13], %16 {strides = array<i32>} : memref<1x128xf32, #tpu.memory_space<vmem>>, vector<1x128xf32>,
    %23 = arith.mulf %16, %21 : vector<1x128xf32>
    %c0_14 = arith.constant 0 : index
    %c0_15 = arith.constant 0 : index
    %24 = vector.load %arg9[%c0_14, %c0_15] : memref<1x128xf32, #tpu.memory_space<vmem>>, vector<1x128xf32>
    tpu.vector_store %arg9[%c0_14, %c0_15], %23 {strides = array<i32>} : memref<1x128xf32, #tpu.memory_space<vmem>>, vector<1x128xf32>,
    %c0_16 = arith.constant 0 : index
    %c0_17 = arith.constant 0 : index
    %25 = vector.load %arg6[%c0_16, %c0_17] : memref<32x2xf32, #tpu.memory_space<vmem>>, vector<32x2xf32>
    %c0_18 = arith.constant 0 : index
    %c0_19 = arith.constant 0 : index
    %26 = vector.load %arg7[%c0_18, %c0_19] : memref<2x1xf32, #tpu.memory_space<vmem>>, vector<2x1xf32>
    %27 = vector.extract_strided_slice %25 {offsets = [0, 0], sizes = [32, 1], strides = [1, 1]} : vector<32x2xf32> to vector<32x1xf32>
    %28 = vector.broadcast %27 : vector<32x1xf32> to vector<32x128xf32>
    %29 = arith.mulf %5, %28 : vector<32x128xf32>
    %cst_20 = arith.constant dense<0.000000e+00> : vector<128xf32>
    %30 = vector.multi_reduction <add>, %29, %cst_20 [0] : vector<32x128xf32> to vector<128xf32>
    %31 = vector.shape_cast %30 : vector<128xf32> to vector<1x128xf32>
    %32 = vector.extract_strided_slice %26 {offsets = [0, 0], sizes = [1, 1], strides = [1, 1]} : vector<2x1xf32> to vector<1x1xf32>
    %33 = vector.broadcast %32 : vector<1x1xf32> to vector<1x128xf32>
    %34 = arith.addf %31, %33 : vector<1x128xf32>
    %35 = vector.extract_strided_slice %25 {offsets = [0, 1], sizes = [32, 1], strides = [1, 1]} : vector<32x2xf32> to vector<32x1xf32>
    %36 = vector.broadcast %35 : vector<32x1xf32> to vector<32x128xf32>
    %37 = arith.mulf %5, %36 : vector<32x128xf32>
    %cst_21 = arith.constant dense<0.000000e+00> : vector<128xf32>
    %38 = vector.multi_reduction <add>, %37, %cst_21 [0] : vector<32x128xf32> to vector<128xf32>
    %39 = vector.shape_cast %38 : vector<128xf32> to vector<1x128xf32>
    %40 = vector.extract_strided_slice %26 {offsets = [1, 0], sizes = [1, 1], strides = [1, 1]} : vector<2x1xf32> to vector<1x1xf32>
    %41 = vector.broadcast %40 : vector<1x1xf32> to vector<1x128xf32>
    %42 = arith.addf %39, %41 : vector<1x128xf32>
    %43 = arith.maximumf %34, %42 : vector<1x128xf32>
    %44 = arith.subf %34, %43 : vector<1x128xf32>
    %45 = arith.subf %42, %43 : vector<1x128xf32>
    %46 = math.exp %44 : vector<1x128xf32>
    %47 = math.exp %45 : vector<1x128xf32>
    %48 = arith.addf %46, %47 : vector<1x128xf32>
    %49 = math.log %48 : vector<1x128xf32>
    %50 = arith.subf %44, %49 : vector<1x128xf32>
    %c0_22 = arith.constant 0 : index
    %c0_23 = arith.constant 0 : index
    %51 = vector.load %arg10[%c0_22, %c0_23] : memref<2x128xf32, #tpu.memory_space<vmem>>, vector<1x128xf32>
    tpu.vector_store %arg10[%c0_22, %c0_23], %50 {strides = array<i32>} : memref<2x128xf32, #tpu.memory_space<vmem>>, vector<1x128xf32>,
    %52 = arith.subf %45, %49 : vector<1x128xf32>
    %c1 = arith.constant 1 : index
    %c0_24 = arith.constant 0 : index
    %53 = vector.load %arg10[%c1, %c0_24] : memref<2x128xf32, #tpu.memory_space<vmem>>, vector<1x128xf32>
    tpu.vector_store %arg10[%c1, %c0_24], %52 {strides = array<i32>} : memref<2x128xf32, #tpu.memory_space<vmem>>, vector<1x128xf32>,
    return
  }
  func.func @transform_0(%arg0: i32) -> (i32, i32) {
    %c0_i32 = arith.constant 0 : i32
    %c0_i32_0 = arith.constant 0 : i32
    return %c0_i32, %arg0 : i32, i32
  }
  func.func @transform_1(%arg0: i32) -> (i32, i32) {
    %c0_i32 = arith.constant 0 : i32
    %c0_i32_0 = arith.constant 0 : i32
    return %c0_i32, %arg0 : i32, i32
  }
  func.func @transform_2(%arg0: i32) -> (i32, i32) {
    %c0_i32 = arith.constant 0 : i32
    %c0_i32_0 = arith.constant 0 : i32
    return %c0_i32, %arg0 : i32, i32
  }
  func.func @transform_3(%arg0: i32) -> (i32, i32) {
    %c0_i32 = arith.constant 0 : i32
    %c0_i32_0 = arith.constant 0 : i32
    return %c0_i32, %arg0 : i32, i32
  }
  func.func @transform_4(%arg0: i32) -> (i32, i32) {
    %c0_i32 = arith.constant 0 : i32
    %c0_i32_0 = arith.constant 0 : i32
    return %c0_i32, %arg0 : i32, i32
  }
  func.func @transform_5(%arg0: i32) -> (i32, i32) {
    %c0_i32 = arith.constant 0 : i32
    %c0_i32_0 = arith.constant 0 : i32
    %c0_i32_1 = arith.constant 0 : i32
    return %c0_i32, %c0_i32_0 : i32, i32
  }
  func.func @transform_6(%arg0: i32) -> (i32, i32) {
    %c0_i32 = arith.constant 0 : i32
    %c0_i32_0 = arith.constant 0 : i32
    %c0_i32_1 = arith.constant 0 : i32
    return %c0_i32, %c0_i32_0 : i32, i32
  }
  func.func @transform_7(%arg0: i32) -> (i32, i32) {
    %c0_i32 = arith.constant 0 : i32
    %c0_i32_0 = arith.constant 0 : i32
    return %c0_i32, %arg0 : i32, i32
  }
  func.func @transform_8(%arg0: i32) -> (i32, i32) {
    %c0_i32 = arith.constant 0 : i32
    %c0_i32_0 = arith.constant 0 : i32
    return %c0_i32, %arg0 : i32, i32
  }
  func.func @transform_9(%arg0: i32) -> (i32, i32) {
    %c0_i32 = arith.constant 0 : i32
    %c0_i32_0 = arith.constant 0 : i32
    return %c0_i32, %arg0 : i32, i32
  }
}

</mosaic_0001>

<bundles_post_ra>
// kernel: tpu_custom_call.1
= control target key start
LH: loop header
LB: loop body
LE: loop exit
PB: predicated region body
PF: predicated region fallthrough
CT: control target
= control target key end

     0   :  { %15 = vsyncpa [#allocation3], 0  ;;  %s708_s0 = inlined_call_operand.vmem [shape: f32[32,128], index: 0, kind: input, shape index: {}]   ;;  %s709_s1 = inlined_call_operand.hbm [shape: f32[32,128], index: 1, kind: input, shape index: {}]   ;;  %s710_s2 = inlined_call_operand.hbm [shape: f32[32,128], index: 2, kind: input, shape index: {}]   ;;  %s711_s3 = inlined_call_operand.hbm [shape: f32[32,128], index: 3, kind: input, shape index: {}]   ;;  %s712_s4 = inlined_call_operand.hbm [shape: f32[32,128], index: 4, kind: input, shape index: {}]   ;;  %s713_s5 = inlined_call_operand.vmem [shape: f32[32,2], index: 5, kind: input, shape index: {}]   ;;  %s714_s6 = inlined_call_operand.vmem [shape: f32[2,1], index: 6, kind: input, shape index: {}]   ;;  %s715_s7 = inlined_call_operand.hbm [shape: f32[1,128], index: 7, kind: output, shape index: {0}]   ;;  %s716_s8 = inlined_call_operand.hbm [shape: f32[1,128], index: 8, kind: output, shape index: {1}]   ;;  %s717_s9 = inlined_call_operand.hbm [shape: f32[2,128], index: 9, kind: output, shape index: {2}]  }
   0x1   :  { %16 = vsyncpa [#allocation6], 0 }
   0x2   :  { %17 = vsyncpa [#allocation9], 0 }
   0x3   :  { %18 = vsyncpa [#allocation4], 0 }
   0x4   :  { %19 = vsyncpa [#allocation12], 0  ;;  %s490_s30 = smov [#allocation5]   ;;  %s491_s11 = smov [#allocation2]  }
   0x5   :  { %s39_s10 = sshll.u32 %s490_s30, 4  ;;  %s27_s12 = sshll.u32 %s491_s11, 4  ;;  %s40_s10 = int_to_ptr.vmem [resolvable:$true] %s39_s10  ;;  %s551_s12 = int_to_ptr.vmem [resolvable:$true] %s27_s12 }
   0x6   :  { %s326_s15 = scalar_lea.hbm %s710_s2, 512 }
   0x7   :  { %p327_p0 = scmp.ne.s32.totalorder %s710_s2, %s326_s15  ;;  %p330_p1 = scmp.lt.u32.totalorder %s326_s15, %s710_s2 }
   0x9   :  { %p332_p2 = pnand %p330_p1, %p327_p0 }
   0xb   :  { %335 = shalt.err (!%p332_p2)
}
   0xc   :  { %s336_s20 = scalar_lea.vmem %s40_s10, 512  ;;  %p341_p4 = scmp.lt.s32.totalorder %s40_s10, %s40_s10 }
   0xd   :  { %p337_p3 = scmp.ne.s32.totalorder %s40_s10, %s336_s20  ;;  %p342_p5 = scmp.lt.s32.totalorder %s336_s20, %s336_s20 }
   0xf   :  { %p343_p6 = por %p342_p5, %p341_p4 }
  0x11   :  { %p344_p7 = pnand %p343_p6, %p337_p3 }
  0x13   :  { %347 = shalt.err (!%p344_p7)
}
  0x14   :  { %s492_s21 = smov 128   ;;  %s493_s22 = smov 8  }
  0x15   :  { %45 = dma.hbm_to_vmem [thread:$0]  %s710_s2, 512, %s40_s10, [#allocation6], %s492_s21, %s492_s21, %s493_s22  }
  0x16   :  { %s348_s27 = scalar_lea.hbm %s709_s1, 512 }
  0x17   :  { %p349_p8 = scmp.ne.s32.totalorder %s709_s1, %s348_s27  ;;  %p352_p9 = scmp.lt.u32.totalorder %s348_s27, %s709_s1 }
  0x19   :  { %p354_p10 = pnand %p352_p9, %p349_p8 }
  0x1b   :  { %357 = shalt.err (!%p354_p10)
}
  0x1c   :  { %s358_s13 = scalar_lea.vmem %s551_s12, 512  ;;  %p363_p12 = scmp.lt.s32.totalorder %s551_s12, %s551_s12 }
  0x1d   :  { %p359_p11 = scmp.ne.s32.totalorder %s551_s12, %s358_s13  ;;  %p364_p13 = scmp.lt.s32.totalorder %s358_s13, %s358_s13 }
  0x1f   :  { %p365_p0 = por %p364_p13, %p363_p12 }
  0x21   :  { %p366_p1 = pnand %p365_p0, %p359_p11 }
  0x23   :  { %369 = shalt.err (!%p366_p1)
}
  0x24   :  { %33 = dma.hbm_to_vmem [thread:$0]  %s709_s1, 512, %s551_s12, [#allocation3], %s492_s21, %s492_s21, %s493_s22  }
  0x25   :  { %s494_s14 = smov [#allocation7]   ;;  %s495_s16 = smov [#allocation8]  }
  0x26   :  { %s51_s15 = sshll.u32 %s494_s14, 4  ;;  %s63_s17 = sshll.u32 %s495_s16, 4  ;;  %s52_s15 = int_to_ptr.vmem [resolvable:$true] %s51_s15  ;;  %s588_s17 = int_to_ptr.vmem [resolvable:$true] %s63_s17 }
  0x27   :  { %s370_s20 = scalar_lea.hbm %s711_s3, 512 }
  0x28   :  { %p371_p2 = scmp.ne.s32.totalorder %s711_s3, %s370_s20  ;;  %p374_p3 = scmp.lt.u32.totalorder %s370_s20, %s711_s3 }
  0x2a   :  { %p376_p4 = pnand %p374_p3, %p371_p2 }
  0x2c   :  { %379 = shalt.err (!%p376_p4)
}
  0x2d   :  { %s380_s1 = scalar_lea.vmem %s52_s15, 512  ;;  %p385_p6 = scmp.lt.s32.totalorder %s52_s15, %s52_s15 }
  0x2e   :  { %p381_p5 = scmp.ne.s32.totalorder %s52_s15, %s380_s1  ;;  %p386_p7 = scmp.lt.s32.totalorder %s380_s1, %s380_s1 }
  0x30   :  { %p387_p8 = por %p386_p7, %p385_p6 }
  0x32   :  { %p388_p9 = pnand %p387_p8, %p381_p5 }
  0x34   :  { %391 = shalt.err (!%p388_p9)
}
  0x35   :  { %57 = dma.hbm_to_vmem [thread:$0]  %s711_s3, 512, %s52_s15, [#allocation6], %s492_s21, %s492_s21, %s493_s22  }
  0x36   :  { %s392_s30 = scalar_lea.hbm %s712_s4, 512 }
  0x37   :  { %p393_p10 = scmp.ne.s32.totalorder %s712_s4, %s392_s30  ;;  %p396_p11 = scmp.lt.u32.totalorder %s392_s30, %s712_s4 }
  0x39   :  { %p398_p12 = pnand %p396_p11, %p393_p10 }
  0x3b   :  { %401 = shalt.err (!%p398_p12)
}
  0x3c   :  { %s402_s14 = scalar_lea.vmem %s588_s17, 512  ;;  %p407_p0 = scmp.lt.s32.totalorder %s588_s17, %s588_s17 }
  0x3d   :  { %p403_p13 = scmp.ne.s32.totalorder %s588_s17, %s402_s14  ;;  %p408_p1 = scmp.lt.s32.totalorder %s402_s14, %s402_s14 }
  0x3f   :  { %p409_p2 = por %p408_p1, %p407_p0 }
  0x41   :  { %p410_p3 = pnand %p409_p2, %p403_p13 }
  0x43   :  { %413 = shalt.err (!%p410_p3)
}
  0x44   :  { %69 = dma.hbm_to_vmem [thread:$0]  %s712_s4, 512, %s588_s17, [#allocation9], %s492_s21, %s492_s21, %s493_s22  }
  0x45   :  { %480 = dma.done.wait [#allocation3], 512  }
  0x46   :  { %481 = vsyncadd [#allocation3], 4294966784 }
  0x47   :  { %482 = dma.done.wait [#allocation6], 1024  }
  0x48   :  { %483 = vsyncadd [#allocation6], 4294966272 }
  0x49   :  { %484 = dma.done.wait [#allocation9], 512  }
  0x4a   :  { %485 = vsyncadd [#allocation9], 4294966784  ;;  %v496_v0 = vmov 1   ;;  %v497_v1 = vmov 0   ;;  %v151_v2 = vld [vmem:[%s713_s5] sm:$0xff]  ;;  %v152_v3 = vld [vmem:[%s713_s5 + $0x8] sm:$0xff] }
  0x4b   :  { %308 = vset.pattern.permute.xlu0 %v496_v0  ;;  %309 = vset.pattern.permute.xlu1 %v497_v1  ;;  %v86_v4 = vld [vmem:[%s708_s0] sm:$0xff]  ;;  %v87_v6 = vld [vmem:[%s708_s0 + $0x8] sm:$0xff]  ;;  %v153_v11 = vld [vmem:[%s713_s5 + $0x10] sm:$0xff] }
  0x4c   :  { %158 = vperm.xlu1 %309, %v151_v2   ;;  %196 = vperm.xlu0 %308, %v151_v2   ;;  %v90_v5 = vld [vmem:[#allocation2] sm:$0xff]  ;;  %v91_v7 = vld [vmem:[#allocation2 + $0x8] sm:$0xff]  ;;  %v88_v12 = vld [vmem:[%s708_s0 + $0x10] sm:$0xff] }
  0x4d   :  { %v637_v8 = vmul.f32 %v90_v5, %v86_v4  ;;  %v639_v9 = vmul.f32 %v91_v7, %v87_v6  ;;  %v92_v13 = vld [vmem:[#allocation2 + $0x10] sm:$0xff]  ;;  %v154_v16 = vld [vmem:[%s713_s5 + $0x18] sm:$0xff]  ;;  %v155_v21 = vld [vmem:[%s714_s6] sm:$0x3]  ;;  %s499_s6 = smov [#allocation10]  }
  0x4e   :  { %v649_v14 = vmul.f32 %v92_v13, %v88_v12  ;;  %v89_v17 = vld [vmem:[%s708_s0 + $0x18] sm:$0xff]  ;;  %v94_v24 = vld [vmem:[#allocation5] sm:$0xff]  ;;  %v95_v25 = vld [vmem:[#allocation5 + $0x8] sm:$0xff]  ;;  %s498_s0 = smov [#allocation11]   ;;  %s257_s11 = sshll.u32 %s499_s6, 4  ;;  %s258_s11 = int_to_ptr.vmem [resolvable:$true] %s257_s11 }
  0x4f   :  { %v118_v10 = vadd.f32 %v639_v9, %v637_v8  ;;  %v93_v18 = vld [vmem:[#allocation2 + $0x18] sm:$0xff]  ;;  %v98_v26 = vld [vmem:[#allocation7] sm:$0xff]  ;;  %v99_v27 = vld [vmem:[#allocation7 + $0x8] sm:$0xff]  ;;  %s267_s5 = sshll.u32 %s498_s0, 4  ;;  %s268_s5 = int_to_ptr.vmem [resolvable:$true] %s267_s5 }
  0x50   :  { %163 = vperm.xlu1 %309, %v152_v3   ;;  %200 = vperm.xlu0 %308, %v152_v3   ;;  %v658_v19 = vmul.f32 %v93_v18, %v89_v17  ;;  %v110_v28 = vmul.f32 %v98_v26, %v94_v24  ;;  %v96_v29 = vld [vmem:[#allocation5 + $0x10] sm:$0xff]  ;;  %v102_v31 = vld [vmem:[#allocation8] sm:$0xff]  ;;  %v111_v32 = vmul.f32 %v99_v27, %v95_v25  ;;  %v103_v34 = vld [vmem:[#allocation8 + $0x8] sm:$0xff]  ;;  %s414_s13 = scalar_lea.vmem %s268_s5, 16  ;;  %s418_s2 = scalar_lea.vmem %s268_s5, 32 }
  0x51   :  { %v119_v15 = vadd.f32 %v118_v10, %v649_v14  ;;  %v100_v30 = vld [vmem:[#allocation7 + $0x10] sm:$0xff]  ;;  %v97_v37 = vld [vmem:[#allocation5 + $0x18] sm:$0xff]  ;;  %p415_p4 = scmp.ne.s32.totalorder %s268_s5, %s414_s13  ;;  %p419_p5 = scmp.lt.s32.totalorder %s268_s5, %s268_s5 }
  0x52   :  { %v112_v35 = vmul.f32 %v100_v30, %v96_v29  ;;  %v114_v36 = vmul.f32 %v110_v28, %v102_v31  ;;  %v101_v38 = vld [vmem:[#allocation7 + $0x18] sm:$0xff]  ;;  %v104_v39 = vld [vmem:[#allocation8 + $0x10] sm:$0xff]  ;;  %v115_v40 = vmul.f32 %v111_v32, %v103_v34  ;;  %p420_p6 = scmp.lt.s32.totalorder %s418_s2, %s414_s13 }
  0x53   :  { %v120_v20 = vadd.f32 %v119_v15, %v658_v19  ;;  %v113_v41 = vmul.f32 %v101_v38, %v97_v37  ;;  %v105_v43 = vld [vmem:[#allocation8 + $0x18] sm:$0xff] }
  0x54   :  { %168 = vperm.xlu1 %309, %v153_v11   ;;  %204 = vperm.xlu0 %308, %v153_v11   ;;  %v116_v42 = vmul.f32 %v112_v35, %v104_v39  ;;  %v127_v44 = vadd.f32 %v115_v40, %v114_v36  ;;  %p421_p7 = por %p420_p6, %p419_p5 }
  0x55   :  { %v121_v22 = vrot.slane %v120_v20, 4  ;;  %v117_v46 = vmul.f32 %v113_v41, %v105_v43 }
  0x56   :  { %v128_v47 = vadd.f32 %v127_v44, %v116_v42  ;;  %p422_p8 = pnand %p421_p7, %p415_p4 }
  0x57   :  { %v122_v23 = vadd.f32 %v121_v22, %v120_v20 }
  0x58   :  { %173 = vperm.xlu1 %309, %v154_v16   ;;  %208 = vperm.xlu0 %308, %v154_v16   ;;  %v129_v48 = vadd.f32 %v128_v47, %v117_v46 }
  0x59   :  { %v123_v33 = vrot.slane %v122_v23, 2 }
  0x5a   :  { %v130_v50 = vrot.slane %v129_v48, 4 }
  0x5b   :  { %v124_v45 = vadd.f32 %v123_v33, %v122_v23 }
  0x5c   :  { %310 = vset.pattern.permute.xlu0 %v497_v1  ;;  %v131_v51 = vadd.f32 %v130_v50, %v129_v48 }
  0x5d   :  { %191 = vperm.xlu0 %310, %v155_v21   ;;  %v125_v49 = vrot.slane %v124_v45, 1 }
  0x5e   :  { %v132_v53 = vrot.slane %v131_v51, 2 }
  0x5f   :  { %v126_v52 = vadd.f32 %v125_v49, %v124_v45 }
  0x60   :  { %v133_v54 = vadd.f32 %v132_v53, %v131_v51 }
  0x61   :  { %311 = vset.pattern.permute.xlu0 %v496_v0  ;;  %v295_v55 = vmul.f32 -1.442695, %v126_v52 }
  0x62   :  { %v134_v56 = vrot.slane %v133_v54, 1 }
  0x63   :  { %312 = vpow2.f32 %v295_v55 }
  0x64   :  { %v135_v57 = vadd.f32 %v134_v56, %v133_v54 }
  0x66   :  { %v296_v58 = vmul.f32 -1.442695, %v135_v57 }
  0x68   :  { %314 = vpow2.f32 %v296_v58 }
  0x6d   :  { %v313_v59 = vpop.eup %312 }
  0x6e   :  { %v139_v61 = vadd.f32 1.0, %v313_v59 }
  0x70   :  { %316 = vrcp.f32 %v139_v61 }
  0x72   :  { %v315_v60 = vpop.eup %314 }
  0x73   :  { %v145_v62 = vadd.f32 1.0, %v315_v60 }
  0x75   :  { %318 = vrcp.f32 %v145_v62 }
  0x7a   :  { %v317_v63 = vpop.eup %316 }
  0x7b   :  { %148 = vst [vmem:[#allocation10] sm:$0x1] %v317_v63 }
  0x7f   :  { %v319_v0 = vpop.eup %318 }
  0x80   :  { %v149_v1 = vmul.f32 %v319_v0, %v317_v63 }
  0x82   :  { %150 = vst [vmem:[#allocation11] sm:$0x1] %v149_v1 }
  0x83   :  { %425 = shalt.err (!%p422_p8)
}
  0x84   :  { %s426_s3 = scalar_lea.hbm %s716_s8, 16 }
  0x85   :  { %p427_p9 = scmp.ne.s32.totalorder %s716_s8, %s426_s3  ;;  %p430_p10 = scmp.lt.u32.totalorder %s426_s3, %s716_s8 }
  0x87   :  { %p432_p11 = pnand %p430_p10, %p427_p9 }
  0x89   :  { %435 = shalt.err (!%p432_p11)
}
  0x8a   :  { %270 = dma.vmem_to_hbm [thread:$0]  %s268_s5, 16, %s716_s8, [#allocation12]  }
  0x8b   :  { %s436_s21 = scalar_lea.vmem %s258_s11, 16  ;;  %s440_s22 = scalar_lea.vmem %s258_s11, 32 }
  0x8c   :  { %p437_p12 = scmp.ne.s32.totalorder %s258_s11, %s436_s21  ;;  %p441_p13 = scmp.lt.s32.totalorder %s258_s11, %s258_s11 }
  0x8d   :  { %p442_p0 = scmp.lt.s32.totalorder %s440_s22, %s436_s21 }
  0x8f   :  { %p443_p1 = por %p442_p0, %p441_p13 }
  0x91   :  { %p444_p2 = pnand %p443_p1, %p437_p12 }
  0x93   :  { %447 = shalt.err (!%p444_p2)
}
  0x94   :  { %s448_s24 = scalar_lea.hbm %s715_s7, 16 }
  0x95   :  { %p449_p3 = scmp.ne.s32.totalorder %s715_s7, %s448_s24  ;;  %p452_p4 = scmp.lt.u32.totalorder %s448_s24, %s715_s7 }
  0x97   :  { %p454_p5 = pnand %p452_p4, %p449_p3 }
  0x99   :  { %457 = shalt.err (!%p454_p5)
}
  0x9a   :  { %260 = dma.vmem_to_hbm [thread:$0]  %s258_s11, 16, %s715_s7, [#allocation4]  }
  0x9b   :  { %s500_s7 = smov [#allocation13]  }
  0x9c   :  { %s277_s28 = sshll.u32 %s500_s7, 4  ;;  %s278_s28 = int_to_ptr.vmem [resolvable:$true] %s277_s28 }
  0x9d   :  { %s458_s29 = scalar_lea.vmem %s278_s28, 32  ;;  %p463_p7 = scmp.lt.s32.totalorder %s278_s28, %s278_s28 }
  0x9e   :  { %p459_p6 = scmp.ne.s32.totalorder %s278_s28, %s458_s29  ;;  %p464_p8 = scmp.lt.s32.totalorder %s458_s29, %s458_s29 }
  0xa0   :  { %p465_p9 = por %p464_p8, %p463_p7 }
  0xa2   :  { %p466_p10 = pnand %p465_p9, %p459_p6 }
  0xcb   :  { %v159_v2 = vpop.permute.xlu1 %158  ;;  %v197_v3 = vpop.permute.xlu0 %196 }
  0xcc   :  { %v176_v12 = vmul.f32 %v159_v2, %v637_v8  ;;  %v211_v13 = vmul.f32 %v197_v3, %v637_v8 }
  0xcf   :  { %v164_v4 = vpop.permute.xlu1 %163  ;;  %v201_v5 = vpop.permute.xlu0 %200 }
  0xd0   :  { %v177_v6 = vmul.f32 %v164_v4, %v639_v9  ;;  %v212_v7 = vmul.f32 %v201_v5, %v639_v9 }
  0xd2   :  { %v180_v17 = vadd.f32 %v177_v6, %v176_v12  ;;  %v215_v18 = vadd.f32 %v212_v7, %v211_v13 }
  0xd3   :  { %v169_v10 = vpop.permute.xlu1 %168  ;;  %v205_v11 = vpop.permute.xlu0 %204 }
  0xd4   :  { %v178_v15 = vmul.f32 %v169_v10, %v649_v14  ;;  %v213_v16 = vmul.f32 %v205_v11, %v649_v14 }
  0xd6   :  { %v181_v22 = vadd.f32 %v180_v17, %v178_v15  ;;  %v216_v23 = vadd.f32 %v215_v18, %v213_v16 }
  0xd7   :  { %v174_v20 = vpop.permute.xlu1 %173  ;;  %v209_v21 = vpop.permute.xlu0 %208 }
  0xd8   :  { %v179_v24 = vmul.f32 %v174_v20, %v658_v19  ;;  %v214_v9 = vmul.f32 %v209_v21, %v658_v19 }
  0xda   :  { %v182_v25 = vadd.f32 %v181_v22, %v179_v24  ;;  %v217_v26 = vadd.f32 %v216_v23, %v214_v9 }
  0xdc   :  { %v183_v27 = vrot.slane %v182_v25, 4  ;;  %v218_v28 = vrot.slane %v217_v26, 4  ;;  %v192_v35 = vpop.permute.xlu0 %191 }
  0xde   :  { %v184_v29 = vadd.f32 %v183_v27, %v182_v25  ;;  %v219_v8 = vadd.f32 %v218_v28, %v217_v26 }
  0xe0   :  { %v185_v30 = vrot.slane %v184_v29, 2  ;;  %v220_v31 = vrot.slane %v219_v8, 2 }
  0xe2   :  { %v186_v32 = vadd.f32 %v185_v30, %v184_v29  ;;  %v221_v14 = vadd.f32 %v220_v31, %v219_v8 }
  0xe4   :  { %v187_v33 = vrot.slane %v186_v32, 1  ;;  %v222_v34 = vrot.slane %v221_v14, 1 }
  0xe6   :  { %v188_v36 = vadd.f32 %v187_v33, %v186_v32  ;;  %v223_v37 = vadd.f32 %v222_v34, %v221_v14 }
  0xe8   :  { %v224_v38 = vadd.f32 %v223_v37, %v192_v35  ;;  %v194_v39 = vadd.f32 %v192_v35, %v188_v36 }
  0xea   :  { %v226_v40 = vrot.slane %v224_v38, 1 }
  0xec   :  { %v228_v41 = vmax.f32 %v194_v39, %v226_v40 }
  0xee   :  { %v229_v19 = vsub.f32 %v194_v39, %v228_v41  ;;  %v231_v42 = vrot.slane %v228_v41, 7 }
  0xf0   :  { %v233_v43 = vsub.f32 %v224_v38, %v231_v42  ;;  %v234_v44 = vmul.f32 1.442695, %v229_v19 }
  0xf2   :  { %v236_v45 = vmul.f32 1.442695, %v233_v43 }
  0xf4   :  { %320 = vpow2.f32 %v236_v45 }
  0xf5   :  { %322 = vpow2.f32 %v234_v44 }
  0xfe   :  { %v321_v46 = vpop.eup %320 }
  0xff   :  { %v239_v47 = vrot.slane %v321_v46, 1  ;;  %v323_v48 = vpop.eup %322 }
 0x101   :  { %v241_v49 = vadd.f32 %v323_v48, %v239_v47 }
 0x103   :  { %324 = vlog2.f32 %v241_v49 }
 0x10d   :  { %v325_v50 = vpop.eup %324 }
 0x10e   :  { %v243_v51 = vmul.f32 0.6931472, %v325_v50 }
 0x110   :  { %v244_v52 = vsub.f32 %v229_v19, %v243_v51  ;;  %v247_v53 = vrot.slane %v243_v51, 7 }
 0x112   :  { %v249_v54 = vsub.f32 %v233_v43, %v247_v53  ;;  %245 = vst [vmem:[#allocation13] sm:$0x1] %v244_v52 }
 0x114   :  { %250 = vst [vmem:[#allocation13] sm:$0x2] %v249_v54 }
 0x115   :  { %469 = shalt.err (!%p466_p10)
}
 0x116   :  { %s470_s5 = scalar_lea.hbm %s717_s9, 32 }
 0x117   :  { %p471_p11 = scmp.ne.s32.totalorder %s717_s9, %s470_s5  ;;  %p474_p12 = scmp.lt.u32.totalorder %s470_s5, %s717_s9 }
 0x119   :  { %p476_p13 = pnand %p474_p12, %p471_p11 }
 0x11b   :  { %479 = shalt.err (!%p476_p13)
}
 0x11c   :  { %280 = dma.vmem_to_hbm [thread:$0]  %s278_s28, 32, %s717_s9, [#allocation12]  }
 0x11d   :  { %486 = dma.done.wait [#allocation4], 16  }
 0x11e   :  { %487 = vsyncadd [#allocation4], 4294967280 }
 0x11f   :  { %488 = dma.done.wait [#allocation12], 48  }
 0x120   :  { %489 = vsyncadd [#allocation12], 4294967248 }
 0x121   :  { %290 = vsyncpa [#allocation3], 1 }
 0x122   :  { %291 = vsyncpa [#allocation6], 1 }
 0x123   :  { %292 = vsyncpa [#allocation9], 1 }
 0x124   :  { %293 = vsyncpa [#allocation4], 1 }
 0x125   :  { %294 = vsyncpa [#allocation12], 1 }

</bundles_post_ra>
